<compile_context>
chip_gen: v5e
topology: v5e:2x2
jax: 0.10.0
libtpu: 0.0.40
codegen_flags: <defaults>
</compile_context>

<pallas_src>
import functools

import jax
import jax.numpy as jnp
from jax.experimental import pallas as pl
from jax.experimental.pallas import tpu as pltpu

_ROW_ALIGN = 16          # bf16 sublane packing: one bf16 vreg holds (16, 128)
_MAX_BATCH_TILE = 8192   # x tile + out tile double-buffered stays << 16 MiB


def _round_up(n, m):
    return ((n + m - 1) // m) * m


def qnetwork_kernel(x_ref, w1_ref, b1_ref, w2_ref, b2_ref, o_ref):
    # fc1 -> ReLU -> fc2 on one (tb, I) batch tile.
    # bf16 MXU operands, f32 accumulation; bias-add / ReLU on the VPU in f32.
    x = x_ref[...].astype(jnp.bfloat16)
    h = jnp.dot(x, w1_ref[...], preferred_element_type=jnp.float32)
    h = jnp.maximum(h + b1_ref[...], 0.0)                      # (tb, H), f32
    y = jnp.dot(h.astype(w2_ref.dtype), w2_ref[...],
                preferred_element_type=jnp.float32)
    o_ref[...] = (y + b2_ref[...]).astype(o_ref.dtype)         # (tb, O)


def prepare_params(w1, b1, w2, b2):
    """One-time (per weight update) cast / reshape of the QNetwork parameters.

    Hoisted out of the per-call forward so each inference step only streams x.
    """
    return (
        w1.astype(jnp.bfloat16),                 # (I, H)
        b1.astype(jnp.float32).reshape(1, -1),   # (1, H)
        w2.astype(jnp.bfloat16),                 # (H, O)
        b2.astype(jnp.float32).reshape(1, -1),   # (1, O)
    )


def _pick_batch_tile(B, batch_tile):
    # Prefer >= 2 batch tiles when the batch is big enough (v7x: the two
    # TensorCores split the "parallel" grid axis); otherwise one tile that
    # exactly covers the batch (block == full array dim is always legal).
    target = min(batch_tile, max(-(-B // 2), _ROW_ALIGN), _MAX_BATCH_TILE)
    tb = _round_up(target, _ROW_ALIGN)
    if tb >= B:
        tb = B
    return tb


@functools.partial(jax.jit, static_argnames="batch_tile")
def qnetwork_forward(x, params, *, batch_tile=4096):
    """QNetwork forward: relu(x @ w1 + b1) @ w2 + b2, via a Pallas TPU kernel."""
    w1, b1, w2, b2 = params
    B, I = x.shape
    H = w1.shape[1]
    O = w2.shape[1]

    tb = _pick_batch_tile(B, batch_tile)
    grid = (pl.cdiv(B, tb),)

    return pl.pallas_call(
        qnetwork_kernel,
        out_shape=jax.ShapeDtypeStruct((B, O), jnp.float32),
        grid_spec=pltpu.PrefetchScalarGridSpec(
            num_scalar_prefetch=0,
            grid=grid,
            in_specs=[
                # Activations: tiled along the batch grid axis, natural width I.
                pl.BlockSpec((tb, I), lambda i: (i, 0)),
                # Weights / biases: same block every step -> VMEM-resident.
                pl.BlockSpec((I, H), lambda i: (0, 0)),
                pl.BlockSpec((1, H), lambda i: (0, 0)),
                pl.BlockSpec((H, O), lambda i: (0, 0)),
                pl.BlockSpec((1, O), lambda i: (0, 0)),
            ],
            out_specs=pl.BlockSpec((tb, O), lambda i: (i, 0)),
        ),
        compiler_params=pltpu.CompilerParams(
            # Batch tiles are independent -> shard across TensorCores (v7x).
            dimension_semantics=("parallel",),
        ),
    )(x, w1, b1, w2, b2)


def init_params(key, input_size, hidden_size, output_size):
    # Deterministic init mimicking nn.Linear's U(-1/sqrt(fan_in), 1/sqrt(fan_in)).
    k1, k2, k3, k4 = jax.random.split(key, 4)
    lim1 = 1.0 / jnp.sqrt(input_size)
    lim2 = 1.0 / jnp.sqrt(hidden_size)
    w1 = jax.random.uniform(k1, (input_size, hidden_size), jnp.float32, -lim1, lim1)
    b1 = jax.random.uniform(k2, (hidden_size,), jnp.float32, -lim1, lim1)
    w2 = jax.random.uniform(k3, (hidden_size, output_size), jnp.float32, -lim2, lim2)
    b2 = jax.random.uniform(k4, (output_size,), jnp.float32, -lim2, lim2)
    return w1, b1, w2, b2


def _ref_bf16(x, w1, b1, w2, b2):
    # Reference matching the in-kernel numerics (bf16 operands, f32 accumulate).
    xb, w1b, w2b = (t.astype(jnp.bfloat16) for t in (x, w1, w2))
    h = jnp.dot(xb, w1b, preferred_element_type=jnp.float32) + b1.reshape(1, -1)
    h = jnp.maximum(h, 0.0)
    y = jnp.dot(h.astype(jnp.bfloat16), w2b, preferred_element_type=jnp.float32)
    return y + b2.reshape(1, -1)


if __name__ == "__main__":
    key = jax.random.PRNGKey(0)
    kx, kp, kx2 = jax.random.split(key, 3)

    batch, input_size, hidden_size, output_size = 8, 16, 32, 4
    x = jax.random.normal(kx, (batch, input_size), jnp.float32)
    raw = init_params(kp, input_size, hidden_size, output_size)
    params = prepare_params(*raw)   # cast/reshape once, reused across calls

    # Small (acting-path) batch.
    out = qnetwork_forward(x, params)
    jax.block_until_ready(out)
    assert out.shape == (batch, output_size)
    assert jnp.allclose(out, _ref_bf16(x, *raw), atol=1e-3, rtol=1e-3)

    # Sanity check against pure-f32 PyTorch semantics (loose tol for bf16 operands).
    w1, b1, w2, b2 = raw
    ref32 = jnp.maximum(x @ w1 + b1.reshape(1, -1), 0.0) @ w2 + b2.reshape(1, -1)
    assert jnp.allclose(out, ref32, atol=5e-2, rtol=5e-2)

    # Replay-style batch: non-tile-multiple size -> ragged last tile + >=2 grid tiles.
    x_big = jax.random.normal(kx2, (300, input_size), jnp.float32)
    out_big = qnetwork_forward(x_big, params, batch_tile=128)
    jax.block_until_ready(out_big)
    assert out_big.shape == (300, output_size)
    assert jnp.allclose(out_big, _ref_bf16(x_big, *raw), atol=1e-3, rtol=1e-3)

    print("KERNEL_OK")
</pallas_src>

<mosaic_0001>
module attributes {stable_mosaic.version = 11 : i64} {
  func.func @qnetwork_kernel(%arg0: i32, %arg1: memref<8x16xf32, #tpu.memory_space<vmem>>, %arg2: memref<16x32xbf16, #tpu.memory_space<vmem>>, %arg3: memref<1x32xf32, #tpu.memory_space<vmem>>, %arg4: memref<32x4xbf16, #tpu.memory_space<vmem>>, %arg5: memref<1x4xf32, #tpu.memory_space<vmem>>, %arg6: memref<8x4xf32, #tpu.memory_space<vmem>>) attributes {dimension_semantics = [#tpu.dimension_semantics<parallel>], iteration_bounds = array<i64: 1>, scalar_prefetch = 0 : i64, scratch_operands = 0 : i64, tpu.core_type = #tpu.core_type<tc>, window_params = [{transform_indices = @transform_0, window_bounds = array<i64: 8, 16>}, {pipeline_mode = #tpu.pipeline_mode<synchronous>, transform_indices = @transform_1, window_bounds = array<i64: 16, 32>}, {pipeline_mode = #tpu.pipeline_mode<synchronous>, transform_indices = @transform_2, window_bounds = array<i64: 1, 32>}, {pipeline_mode = #tpu.pipeline_mode<synchronous>, transform_indices = @transform_3, window_bounds = array<i64: 32, 4>}, {pipeline_mode = #tpu.pipeline_mode<synchronous>, transform_indices = @transform_4, window_bounds = array<i64: 1, 4>}, {transform_indices = @transform_5, window_bounds = array<i64: 8, 4>}]} {
    %c0 = arith.constant 0 : index
    %c0_0 = arith.constant 0 : index
    %0 = vector.load %arg1[%c0, %c0_0] : memref<8x16xf32, #tpu.memory_space<vmem>>, vector<8x16xf32>
    %1 = arith.truncf %0 : vector<8x16xf32> to vector<8x16xbf16>
    %c0_1 = arith.constant 0 : index
    %c0_2 = arith.constant 0 : index
    %2 = vector.load %arg2[%c0_1, %c0_2] : memref<16x32xbf16, #tpu.memory_space<vmem>>, vector<16x32xbf16>
    %cst = arith.constant dense<0.000000e+00> : vector<8x32xf32>
    %3 = tpu.matmul %1, %2, %cst {dimension_numbers = #tpu.dot_dimension_numbers<[1], [0], [0], [1], [0, 0, 1, 1], [], []>} : vector<8x16xbf16>, vector<16x32xbf16>, vector<8x32xf32> -> vector<8x32xf32>
    %c0_3 = arith.constant 0 : index
    %c0_4 = arith.constant 0 : index
    %4 = vector.load %arg3[%c0_3, %c0_4] : memref<1x32xf32, #tpu.memory_space<vmem>>, vector<1x32xf32>
    %5 = vector.broadcast %4 : vector<1x32xf32> to vector<8x32xf32>
    %6 = arith.addf %3, %5 : vector<8x32xf32>
    %cst_5 = arith.constant 0.000000e+00 : f32
    %7 = vector.broadcast %cst_5 : f32 to vector<8x32xf32>
    %8 = arith.maximumf %6, %7 : vector<8x32xf32>
    %9 = arith.truncf %8 : vector<8x32xf32> to vector<8x32xbf16>
    %c0_6 = arith.constant 0 : index
    %c0_7 = arith.constant 0 : index
    %10 = vector.load %arg4[%c0_6, %c0_7] : memref<32x4xbf16, #tpu.memory_space<vmem>>, vector<32x4xbf16>
    %cst_8 = arith.constant dense<0.000000e+00> : vector<8x4xf32>
    %11 = tpu.matmul %9, %10, %cst_8 {dimension_numbers = #tpu.dot_dimension_numbers<[1], [0], [0], [1], [0, 0, 1, 1], [], []>} : vector<8x32xbf16>, vector<32x4xbf16>, vector<8x4xf32> -> vector<8x4xf32>
    %c0_9 = arith.constant 0 : index
    %c0_10 = arith.constant 0 : index
    %12 = vector.load %arg5[%c0_9, %c0_10] : memref<1x4xf32, #tpu.memory_space<vmem>>, vector<1x4xf32>
    %13 = vector.broadcast %12 : vector<1x4xf32> to vector<8x4xf32>
    %14 = arith.addf %11, %13 : vector<8x4xf32>
    %c0_11 = arith.constant 0 : index
    %c0_12 = arith.constant 0 : index
    %15 = vector.load %arg6[%c0_11, %c0_12] : memref<8x4xf32, #tpu.memory_space<vmem>>, vector<8x4xf32>
    tpu.vector_store %arg6[%c0_11, %c0_12], %14 {strides = array<i32>} : memref<8x4xf32, #tpu.memory_space<vmem>>, vector<8x4xf32>,
    return
  }
  func.func @transform_0(%arg0: i32) -> (i32, i32) {
    %c0_i32 = arith.constant 0 : i32
    %c0_i32_0 = arith.constant 0 : i32
    return %arg0, %c0_i32 : i32, i32
  }
  func.func @transform_1(%arg0: i32) -> (i32, i32) {
    %c0_i32 = arith.constant 0 : i32
    %c0_i32_0 = arith.constant 0 : i32
    %c0_i32_1 = arith.constant 0 : i32
    return %c0_i32, %c0_i32_0 : i32, i32
  }
  func.func @transform_2(%arg0: i32) -> (i32, i32) {
    %c0_i32 = arith.constant 0 : i32
    %c0_i32_0 = arith.constant 0 : i32
    %c0_i32_1 = arith.constant 0 : i32
    return %c0_i32, %c0_i32_0 : i32, i32
  }
  func.func @transform_3(%arg0: i32) -> (i32, i32) {
    %c0_i32 = arith.constant 0 : i32
    %c0_i32_0 = arith.constant 0 : i32
    %c0_i32_1 = arith.constant 0 : i32
    return %c0_i32, %c0_i32_0 : i32, i32
  }
  func.func @transform_4(%arg0: i32) -> (i32, i32) {
    %c0_i32 = arith.constant 0 : i32
    %c0_i32_0 = arith.constant 0 : i32
    %c0_i32_1 = arith.constant 0 : i32
    return %c0_i32, %c0_i32_0 : i32, i32
  }
  func.func @transform_5(%arg0: i32) -> (i32, i32) {
    %c0_i32 = arith.constant 0 : i32
    %c0_i32_0 = arith.constant 0 : i32
    return %arg0, %c0_i32 : i32, i32
  }
}

</mosaic_0001>

<bundles_post_ra>
// kernel: qnetwork_forward.1
= control target key start
LH: loop header
LB: loop body
LE: loop exit
PB: predicated region body
PF: predicated region fallthrough
CT: control target
= control target key end

     0   :  { %vm35_vm0 = vcmask 130048   ;;  %vm74_vm1 = vcmask 261120   ;;  %vm91_vm2 = vcmask 31744   ;;  %s167_s1 = inlined_call_operand.vmem [shape: bf16[16,32], index: 1, kind: input, shape index: {}]   ;;  %s168_s0 = inlined_call_operand.vmem [shape: f32[8,16], index: 0, kind: input, shape index: {}]   ;;  %s169_s2 = inlined_call_operand.vmem [shape: f32[1,32], index: 2, kind: input, shape index: {}]   ;;  %s170_s4 = inlined_call_operand.vmem [shape: f32[1,4], index: 4, kind: input, shape index: {}]   ;;  %s171_s3 = inlined_call_operand.vmem [shape: bf16[32,4], index: 3, kind: input, shape index: {}]   ;;  %s172_s5 = inlined_call_operand.vmem [shape: f32[8,4], index: 5, kind: output, shape index: {}]  }
   0x1   :  { %v111_v0 = vld [vmem:[%s167_s1] sm:$0xff]  ;;  %v113_v3 = vld [vmem:[%s171_s3 + $0x8] sm:$0xff] }
   0x2   :  { %v21_v1 = vld [vmem:[%s168_s0] sm:$0xff]  ;;  %46 = vmatpush.bf16.msra.mxu0 %v111_v0  ;;  %84 = vmatpush.bf16.msra.mxu1 %v113_v3 }
   0x3   :  { %v22_v2 = vpack.c.bf16 %v21_v1, %v21_v1  ;;  %v112_v4 = vld [vmem:[%s171_s3] sm:$0xff] }
   0x4   :  { %v114_v5 = vld [vmem:[%s169_s2] ss:$0 sm:$0xff] }
   0x5   :  { %101 = vmatmul.msk.bf16.vlgmr.msra.gmra.mxu0 %vm35_vm0, %v22_v2  ;;  %v115_v11 = vld [vmem:[%s170_s4] ss:$0 sm:$0xff] }
   0x6   :  { %85 = vmatpush.bf16.msra.mxu1 %v112_v4 }
  0x82   :  { %v48_v6 = vpop.f32.mrf.mxu0 }
  0x83   :  { %v49_v7 = vadd.f32 %v114_v5, %v48_v6 }
  0x85   :  { %v52_v8 = vmax.f32 %v49_v7, 0.0 }
  0x87   :  { %v53_v9 = vpack.c.bf16 %v52_v8, %v52_v8 }
  0x89   :  { %110 = vmatmul.msk.bf16.vlgmr.msra.gmra.mxu1 %vm74_vm1, %v53_v9 }
  0x8a   :  { %v50_v10 = vpop.f32.mrf.mxu0 }
 0x106   :  { %v87_v12 = vpop.f32.mrf.mxu1 }
 0x107   :  { %v88_v13 = vadd.f32 %v115_v11, %v87_v12 }
 0x109   :  { %92 = vst.msk [vmem:[%s172_s5] sm:$0xff] %vm91_vm2, %v88_v13 }
 0x10e   :  { %v89_v14 = vpop.f32.mrf.mxu1 }

</bundles_post_ra>
